<compile_context>
chip_gen: v5e
topology: v5e:2x2
jax: 0.10.0
libtpu: 0.0.40
codegen_flags: <defaults>
</compile_context>

<pallas_src>
import jax
import jax.numpy as jnp
from jax import lax
from jax.experimental import pallas as pl
from jax.experimental.pallas import tpu as pltpu

# ------------------------- model hyperparameters (small) -------------------------
BATCH = 2
SEQ = 8
HIDDEN = 32
NUM_HEADS = 4
HEAD_DIM = HIDDEN // NUM_HEADS
FF_DIM = 4 * HIDDEN
LN_EPS = 1e-5
NEG_INF = -1e9


def _layernorm(v, gamma, beta):
    mu = jnp.mean(v, axis=-1, keepdims=True)
    var = jnp.mean((v - mu) ** 2, axis=-1, keepdims=True)
    return (v - mu) * lax.rsqrt(var + LN_EPS) * gamma + beta


def _gelu_new(v):
    # GPT-2 "gelu_new" (tanh approximation)
    return 0.5 * v * (1.0 + jnp.tanh(0.7978845608028654 * (v + 0.044715 * v * v * v)))


def gpt2_block_kernel(
    x_ref,        # (S, H) f32   -- one batch element per grid step
    pad_ref,      # (1, S) f32   -- additive key-padding mask for this batch element
    ln1_g_ref, ln1_b_ref,        # (1, H) f32
    wqkv_ref, bqkv_ref,          # (H, 3H) bf16 / (1, 3H) f32, head-major [q|k|v] per head,
                                 #   1/sqrt(head_dim) folded into the q columns
    wproj_ref, bproj_ref,        # (H, H) bf16, (1, H) f32
    ln2_g_ref, ln2_b_ref,        # (1, H) f32
    wff1_ref, bff1_ref,          # (H, 4H) bf16, (1, 4H) f32
    wff2_ref, bff2_ref,          # (4H, H) bf16, (1, H) f32
    out_ref,      # (S, H) f32
):
    f32 = jnp.float32
    bf16 = jnp.bfloat16
    x = x_ref[...]                                                    # (S, H)

    # ---- rc1: pre-LN + fused-QKV causal self-attention + residual ----
    h = _layernorm(x, ln1_g_ref[...], ln1_b_ref[...])
    qkv = jnp.dot(h.astype(bf16), wqkv_ref[...],
                  preferred_element_type=f32) + bqkv_ref[...]         # (S, 3H), head-major

    # Split per head (lane slices of the fused result; heads become the batch dim).
    qkvh = jnp.stack(
        [qkv[:, i * 3 * HEAD_DIM:(i + 1) * 3 * HEAD_DIM] for i in range(NUM_HEADS)],
        axis=0)                                                       # (NH, S, 3*HD)
    q = qkvh[..., 0:HEAD_DIM]                                         # (NH, S, HD), scale folded
    k = qkvh[..., HEAD_DIM:2 * HEAD_DIM]
    v = qkvh[..., 2 * HEAD_DIM:3 * HEAD_DIM]

    # Causal mask generated in-kernel (two iota compares), plus additive key padding.
    qi = lax.broadcasted_iota(jnp.int32, (SEQ, SEQ), 0)
    ki = lax.broadcasted_iota(jnp.int32, (SEQ, SEQ), 1)
    mask = jnp.where(qi >= ki, 0.0, NEG_INF).astype(f32) + pad_ref[...]   # (S, S)

    s = jnp.einsum("hqd,hkd->hqk", q.astype(bf16), k.astype(bf16),
                   preferred_element_type=f32)                        # (NH, S, S)
    s = s + mask[None]
    s = s - jnp.max(s, axis=-1, keepdims=True)
    p = jnp.exp(s)
    p = p * pl.reciprocal(jnp.sum(p, axis=-1, keepdims=True), approx=True)

    ctx = jnp.einsum("hqk,hkd->hqd", p.astype(bf16), v.astype(bf16),
                     preferred_element_type=f32)                      # (NH, S, HD)
    # Head concat folded back to (S, H) lanes -> single output-projection matmul.
    ctx2 = jnp.concatenate([ctx[i] for i in range(NUM_HEADS)], axis=-1)   # (S, H)
    attn = jnp.dot(ctx2.astype(bf16), wproj_ref[...],
                   preferred_element_type=f32) + bproj_ref[...]       # (S, H)
    h1 = x + attn                                                     # residual 1 (dropout=id)

    # ---- rc2: pre-LN + feed-forward + residual ----
    g = _layernorm(h1, ln2_g_ref[...], ln2_b_ref[...])
    f = jnp.dot(g.astype(bf16), wff1_ref[...],
                preferred_element_type=f32) + bff1_ref[...]           # (S, 4H) = 128 lanes
    f = _gelu_new(f)
    f = jnp.dot(f.astype(bf16), wff2_ref[...],
                preferred_element_type=f32) + bff2_ref[...]           # (S, H)
    out_ref[...] = h1 + f                                             # residual 2 (dropout=id)


def pack_params(params):
    """One-time weight packing (hoisted out of the per-call jit path):
    bf16 casts for MXU operands, head-major [q|k|v] column repack of the fused QKV
    weight, and 1/sqrt(head_dim) folded into the Q columns / bias."""
    bf16 = jnp.bfloat16
    H, NH, HD = HIDDEN, NUM_HEADS, HEAD_DIM
    scale = 1.0 / (HD ** 0.5)

    w_qkv, b_qkv = params["w_qkv"], params["b_qkv"]
    wq = w_qkv[:, 0 * H:1 * H] * scale
    wk = w_qkv[:, 1 * H:2 * H]
    wv = w_qkv[:, 2 * H:3 * H]
    bq = b_qkv[:, 0 * H:1 * H] * scale
    bk = b_qkv[:, 1 * H:2 * H]
    bv = b_qkv[:, 2 * H:3 * H]

    def head_major(a_q, a_k, a_v):
        return jnp.concatenate(
            [jnp.concatenate([a_q[:, h * HD:(h + 1) * HD],
                              a_k[:, h * HD:(h + 1) * HD],
                              a_v[:, h * HD:(h + 1) * HD]], axis=1)
             for h in range(NH)], axis=1)

    return {
        "ln1_g": params["ln1_g"], "ln1_b": params["ln1_b"],
        "wqkv": head_major(wq, wk, wv).astype(bf16),
        "bqkv": head_major(bq, bk, bv),
        "wproj": params["w_proj"].astype(bf16), "bproj": params["b_proj"],
        "ln2_g": params["ln2_g"], "ln2_b": params["ln2_b"],
        "wff1": params["w_ff1"].astype(bf16), "bff1": params["b_ff1"],
        "wff2": params["w_ff2"].astype(bf16), "bff2": params["b_ff2"],
    }


def _full_spec(a):
    nd = a.ndim

    def idx(b):
        return (0,) * nd

    return pl.BlockSpec(a.shape, idx)


@jax.jit
def gpt2_block(x, attn_mask, packed):
    """x: (B, S, H) f32; attn_mask: (B, 1, S) additive f32; packed: pack_params() output."""
    B, S, H = x.shape
    args = (
        x, attn_mask,
        packed["ln1_g"], packed["ln1_b"],
        packed["wqkv"], packed["bqkv"],
        packed["wproj"], packed["bproj"],
        packed["ln2_g"], packed["ln2_b"],
        packed["wff1"], packed["bff1"],
        packed["wff2"], packed["bff2"],
    )
    in_specs = [
        pl.BlockSpec((None, S, H), lambda b: (b, 0, 0)),   # x: one batch element per step
        pl.BlockSpec((None, 1, S), lambda b: (b, 0, 0)),   # key-padding mask row
    ] + [_full_spec(a) for a in args[2:]]                  # weights fully resident

    out = pl.pallas_call(
        gpt2_block_kernel,
        grid=(B,),
        in_specs=in_specs,
        out_specs=pl.BlockSpec((None, S, H), lambda b: (b, 0, 0)),
        out_shape=jax.ShapeDtypeStruct((B, S, H), jnp.float32),
        compiler_params=pltpu.CompilerParams(dimension_semantics=("parallel",)),
    )(*args)
    return out


def init_params(key):
    ks = jax.random.split(key, 6)
    std = 0.02
    return {
        "ln1_g": jnp.ones((1, HIDDEN), jnp.float32),
        "ln1_b": jnp.zeros((1, HIDDEN), jnp.float32),
        "w_qkv": std * jax.random.normal(ks[0], (HIDDEN, 3 * HIDDEN), jnp.float32),
        "b_qkv": jnp.zeros((1, 3 * HIDDEN), jnp.float32),
        "w_proj": std * jax.random.normal(ks[1], (HIDDEN, HIDDEN), jnp.float32),
        "b_proj": jnp.zeros((1, HIDDEN), jnp.float32),
        "ln2_g": jnp.ones((1, HIDDEN), jnp.float32),
        "ln2_b": jnp.zeros((1, HIDDEN), jnp.float32),
        "w_ff1": std * jax.random.normal(ks[2], (HIDDEN, FF_DIM), jnp.float32),
        "b_ff1": jnp.zeros((1, FF_DIM), jnp.float32),
        "w_ff2": std * jax.random.normal(ks[3], (FF_DIM, HIDDEN), jnp.float32),
        "b_ff2": jnp.zeros((1, HIDDEN), jnp.float32),
    }


def reference_block(x, attn_mask, params):
    """Pure-JAX f32 reference mirroring the PyTorch module (eval mode)."""
    B, S, H = x.shape

    def ln(v, g, b):
        mu = v.mean(-1, keepdims=True)
        var = ((v - mu) ** 2).mean(-1, keepdims=True)
        return (v - mu) / jnp.sqrt(var + LN_EPS) * g + b

    h = ln(x, params["ln1_g"], params["ln1_b"])
    qkv = h @ params["w_qkv"] + params["b_qkv"]
    q, k, v = jnp.split(qkv, 3, axis=-1)

    def heads(t):
        return t.reshape(B, S, NUM_HEADS, HEAD_DIM).transpose(0, 2, 1, 3)

    q, k, v = heads(q), heads(k), heads(v)
    s = jnp.einsum("bhqd,bhkd->bhqk", q, k) / (HEAD_DIM ** 0.5)
    causal = jnp.tril(jnp.ones((S, S), bool))
    s = jnp.where(causal, s, NEG_INF) + attn_mask[:, None, :, :]
    p = jax.nn.softmax(s, axis=-1)
    ctx = jnp.einsum("bhqk,bhkd->bhqd", p, v).transpose(0, 2, 1, 3).reshape(B, S, H)
    attn = ctx @ params["w_proj"] + params["b_proj"]
    h1 = x + attn
    g = ln(h1, params["ln2_g"], params["ln2_b"])
    f = g @ params["w_ff1"] + params["b_ff1"]
    f = 0.5 * f * (1.0 + jnp.tanh(0.7978845608028654 * (f + 0.044715 * f ** 3)))
    f = f @ params["w_ff2"] + params["b_ff2"]
    return h1 + f


if __name__ == "__main__":
    key = jax.random.PRNGKey(0)
    k_x, k_p = jax.random.split(key)
    x = jax.random.normal(k_x, (BATCH, SEQ, HIDDEN), jnp.float32)
    # No padding: additive mask of zeros (shape (B, 1, S)); masked keys would be -1e9.
    attn_mask = jnp.zeros((BATCH, 1, SEQ), jnp.float32)
    params = init_params(k_p)
    packed = pack_params(params)          # one-time weight packing, outside the call path

    out = jax.block_until_ready(gpt2_block(x, attn_mask, packed))
    assert out.shape == (BATCH, SEQ, HIDDEN) and out.dtype == jnp.float32
    assert bool(jnp.all(jnp.isfinite(out)))

    # Sanity check against the f32 reference (bf16 MXU inputs + approx reciprocal give
    # only ~1e-3-level deviations at these magnitudes).
    ref = reference_block(x, attn_mask, params)
    max_err = float(jnp.max(jnp.abs(out - ref)))
    assert max_err < 5e-2, f"mismatch vs f32 reference: {max_err}"

    print("KERNEL_OK")
</pallas_src>

<mosaic_0001>
module attributes {stable_mosaic.version = 11 : i64} {
  func.func @gpt2_block_kernel(%arg0: i32, %arg1: memref<1x8x32xf32, #tpu.memory_space<vmem>>, %arg2: memref<1x1x8xf32, #tpu.memory_space<vmem>>, %arg3: memref<1x32xf32, #tpu.memory_space<vmem>>, %arg4: memref<1x32xf32, #tpu.memory_space<vmem>>, %arg5: memref<32x96xbf16, #tpu.memory_space<vmem>>, %arg6: memref<1x96xf32, #tpu.memory_space<vmem>>, %arg7: memref<32x32xbf16, #tpu.memory_space<vmem>>, %arg8: memref<1x32xf32, #tpu.memory_space<vmem>>, %arg9: memref<1x32xf32, #tpu.memory_space<vmem>>, %arg10: memref<1x32xf32, #tpu.memory_space<vmem>>, %arg11: memref<32x128xbf16, #tpu.memory_space<vmem>>, %arg12: memref<1x128xf32, #tpu.memory_space<vmem>>, %arg13: memref<128x32xbf16, #tpu.memory_space<vmem>>, %arg14: memref<1x32xf32, #tpu.memory_space<vmem>>, %arg15: memref<1x8x32xf32, #tpu.memory_space<vmem>>) attributes {dimension_semantics = [#tpu.dimension_semantics<parallel>], iteration_bounds = array<i64: 2>, scalar_prefetch = 0 : i64, scratch_operands = 0 : i64, tpu.core_type = #tpu.core_type<tc>, window_params = [{transform_indices = @transform_0, window_bounds = array<i64: 1, 8, 32>}, {transform_indices = @transform_1, window_bounds = array<i64: 1, 1, 8>}, {pipeline_mode = #tpu.pipeline_mode<synchronous>, transform_indices = @transform_2, window_bounds = array<i64: 1, 32>}, {pipeline_mode = #tpu.pipeline_mode<synchronous>, transform_indices = @transform_3, window_bounds = array<i64: 1, 32>}, {pipeline_mode = #tpu.pipeline_mode<synchronous>, transform_indices = @transform_4, window_bounds = array<i64: 32, 96>}, {pipeline_mode = #tpu.pipeline_mode<synchronous>, transform_indices = @transform_5, window_bounds = array<i64: 1, 96>}, {pipeline_mode = #tpu.pipeline_mode<synchronous>, transform_indices = @transform_6, window_bounds = array<i64: 32, 32>}, {pipeline_mode = #tpu.pipeline_mode<synchronous>, transform_indices = @transform_7, window_bounds = array<i64: 1, 32>}, {pipeline_mode = #tpu.pipeline_mode<synchronous>, transform_indices = @transform_8, window_bounds = array<i64: 1, 32>}, {pipeline_mode = #tpu.pipeline_mode<synchronous>, transform_indices = @transform_9, window_bounds = array<i64: 1, 32>}, {pipeline_mode = #tpu.pipeline_mode<synchronous>, transform_indices = @transform_10, window_bounds = array<i64: 32, 128>}, {pipeline_mode = #tpu.pipeline_mode<synchronous>, transform_indices = @transform_11, window_bounds = array<i64: 1, 128>}, {pipeline_mode = #tpu.pipeline_mode<synchronous>, transform_indices = @transform_12, window_bounds = array<i64: 128, 32>}, {pipeline_mode = #tpu.pipeline_mode<synchronous>, transform_indices = @transform_13, window_bounds = array<i64: 1, 32>}, {transform_indices = @transform_14, window_bounds = array<i64: 1, 8, 32>}]} {
    %c0 = arith.constant 0 : index
    %c0_0 = arith.constant 0 : index
    %c0_1 = arith.constant 0 : index
    %0 = vector.load %arg1[%c0, %c0_0, %c0_1] : memref<1x8x32xf32, #tpu.memory_space<vmem>>, vector<1x8x32xf32>
    %1 = vector.shape_cast %0 : vector<1x8x32xf32> to vector<8x32xf32>
    %c0_2 = arith.constant 0 : index
    %c0_3 = arith.constant 0 : index
    %2 = vector.load %arg3[%c0_2, %c0_3] : memref<1x32xf32, #tpu.memory_space<vmem>>, vector<1x32xf32>
    %c0_4 = arith.constant 0 : index
    %c0_5 = arith.constant 0 : index
    %3 = vector.load %arg4[%c0_4, %c0_5] : memref<1x32xf32, #tpu.memory_space<vmem>>, vector<1x32xf32>
    %cst = arith.constant dense<0.000000e+00> : vector<8xf32>
    %4 = vector.multi_reduction <add>, %1, %cst [1] : vector<8x32xf32> to vector<8xf32>
    %5 = vector.shape_cast %4 : vector<8xf32> to vector<8x1xf32>
    %cst_6 = arith.constant 3.200000e+01 : f32
    %6 = vector.broadcast %cst_6 : f32 to vector<8x1xf32>
    %7 = arith.divf %5, %6 : vector<8x1xf32>
    %8 = vector.broadcast %7 : vector<8x1xf32> to vector<8x32xf32>
    %9 = arith.subf %1, %8 : vector<8x32xf32>
    %10 = arith.mulf %9, %9 : vector<8x32xf32>
    %cst_7 = arith.constant dense<0.000000e+00> : vector<8xf32>
    %11 = vector.multi_reduction <add>, %10, %cst_7 [1] : vector<8x32xf32> to vector<8xf32>
    %12 = vector.shape_cast %11 : vector<8xf32> to vector<8x1xf32>
    %cst_8 = arith.constant 3.200000e+01 : f32
    %13 = vector.broadcast %cst_8 : f32 to vector<8x1xf32>
    %14 = arith.divf %12, %13 : vector<8x1xf32>
    %15 = vector.broadcast %7 : vector<8x1xf32> to vector<8x32xf32>
    %16 = arith.subf %1, %15 : vector<8x32xf32>
    %cst_9 = arith.constant 9.99999974E-6 : f32
    %17 = vector.broadcast %cst_9 : f32 to vector<8x1xf32>
    %18 = arith.addf %14, %17 : vector<8x1xf32>
    %19 = math.rsqrt %18 : vector<8x1xf32>
    %20 = vector.broadcast %19 : vector<8x1xf32> to vector<8x32xf32>
    %21 = arith.mulf %16, %20 : vector<8x32xf32>
    %22 = vector.broadcast %2 : vector<1x32xf32> to vector<8x32xf32>
    %23 = arith.mulf %21, %22 : vector<8x32xf32>
    %24 = vector.broadcast %3 : vector<1x32xf32> to vector<8x32xf32>
    %25 = arith.addf %23, %24 : vector<8x32xf32>
    %26 = arith.truncf %25 : vector<8x32xf32> to vector<8x32xbf16>
    %c0_10 = arith.constant 0 : index
    %c0_11 = arith.constant 0 : index
    %27 = vector.load %arg5[%c0_10, %c0_11] : memref<32x96xbf16, #tpu.memory_space<vmem>>, vector<32x96xbf16>
    %cst_12 = arith.constant dense<0.000000e+00> : vector<8x96xf32>
    %28 = tpu.matmul %26, %27, %cst_12 {dimension_numbers = #tpu.dot_dimension_numbers<[1], [0], [0], [1], [0, 0, 1, 1], [], []>} : vector<8x32xbf16>, vector<32x96xbf16>, vector<8x96xf32> -> vector<8x96xf32>
    %c0_13 = arith.constant 0 : index
    %c0_14 = arith.constant 0 : index
    %29 = vector.load %arg6[%c0_13, %c0_14] : memref<1x96xf32, #tpu.memory_space<vmem>>, vector<1x96xf32>
    %30 = vector.broadcast %29 : vector<1x96xf32> to vector<8x96xf32>
    %31 = arith.addf %28, %30 : vector<8x96xf32>
    %32 = vector.extract_strided_slice %31 {offsets = [0, 0], sizes = [8, 24], strides = [1, 1]} : vector<8x96xf32> to vector<8x24xf32>
    %33 = vector.extract_strided_slice %31 {offsets = [0, 24], sizes = [8, 24], strides = [1, 1]} : vector<8x96xf32> to vector<8x24xf32>
    %34 = vector.extract_strided_slice %31 {offsets = [0, 48], sizes = [8, 24], strides = [1, 1]} : vector<8x96xf32> to vector<8x24xf32>
    %35 = vector.extract_strided_slice %31 {offsets = [0, 72], sizes = [8, 24], strides = [1, 1]} : vector<8x96xf32> to vector<8x24xf32>
    %36 = vector.shape_cast %32 : vector<8x24xf32> to vector<1x8x24xf32>
    %37 = vector.shape_cast %33 : vector<8x24xf32> to vector<1x8x24xf32>
    %38 = vector.shape_cast %34 : vector<8x24xf32> to vector<1x8x24xf32>
    %39 = vector.shape_cast %35 : vector<8x24xf32> to vector<1x8x24xf32>
    %40 = tpu.concatenate %36, %37, %38, %39 in 0 : vector<1x8x24xf32>, vector<1x8x24xf32>, vector<1x8x24xf32>, vector<1x8x24xf32> -> vector<4x8x24xf32>
    %41 = vector.extract_strided_slice %40 {offsets = [0, 0, 0], sizes = [4, 8, 8], strides = [1, 1, 1]} : vector<4x8x24xf32> to vector<4x8x8xf32>
    %42 = vector.extract_strided_slice %40 {offsets = [0, 0, 8], sizes = [4, 8, 8], strides = [1, 1, 1]} : vector<4x8x24xf32> to vector<4x8x8xf32>
    %43 = vector.extract_strided_slice %40 {offsets = [0, 0, 16], sizes = [4, 8, 8], strides = [1, 1, 1]} : vector<4x8x24xf32> to vector<4x8x8xf32>
    %44 = tpu.iota {dimensions = array<i32: 0>} : vector<8x8xi32>
    %45 = tpu.iota {dimensions = array<i32: 1>} : vector<8x8xi32>
    %46 = arith.cmpi sge, %44, %45 : vector<8x8xi32>
    %cst_15 = arith.constant 0.000000e+00 : f32
    %cst_16 = arith.constant -1.000000e+09 : f32
    %47 = vector.broadcast %cst_15 : f32 to vector<8x8xf32>
    %48 = vector.broadcast %cst_16 : f32 to vector<8x8xf32>
    %49 = arith.select %46, %47, %48 : vector<8x8xi1>, vector<8x8xf32>
    %c0_17 = arith.constant 0 : index
    %c0_18 = arith.constant 0 : index
    %c0_19 = arith.constant 0 : index
    %50 = vector.load %arg2[%c0_17, %c0_18, %c0_19] : memref<1x1x8xf32, #tpu.memory_space<vmem>>, vector<1x1x8xf32>
    %51 = vector.shape_cast %50 : vector<1x1x8xf32> to vector<1x8xf32>
    %52 = vector.broadcast %51 : vector<1x8xf32> to vector<8x8xf32>
    %53 = arith.addf %49, %52 : vector<8x8xf32>
    %54 = arith.truncf %41 : vector<4x8x8xf32> to vector<4x8x8xbf16>
    %55 = arith.truncf %42 : vector<4x8x8xf32> to vector<4x8x8xbf16>
    "tpu.trace_start"() <{level = 10 : i32, message = "hqd,hkd->hqk"}> : () -> ()
    %cst_20 = arith.constant dense<0.000000e+00> : vector<4x8x8xf32>
    %56 = tpu.matmul %54, %55, %cst_20 {dimension_numbers = #tpu.dot_dimension_numbers<[2], [2], [1], [1], [0, 0, 0, 1, 1, 1], [0], [0]>} : vector<4x8x8xbf16>, vector<4x8x8xbf16>, vector<4x8x8xf32> -> vector<4x8x8xf32>
    "tpu.trace_stop"() : () -> ()
    %57 = vector.shape_cast %53 : vector<8x8xf32> to vector<1x8x8xf32>
    %58 = vector.broadcast %57 : vector<1x8x8xf32> to vector<4x8x8xf32>
    %59 = arith.addf %56, %58 : vector<4x8x8xf32>
    %cst_21 = arith.constant dense<0xFF800000> : vector<4x8xf32>
    %60 = vector.multi_reduction <maximumf>, %59, %cst_21 [2] : vector<4x8x8xf32> to vector<4x8xf32>
    %61 = vector.shape_cast %60 : vector<4x8xf32> to vector<4x8x1xf32>
    %62 = vector.broadcast %61 : vector<4x8x1xf32> to vector<4x8x8xf32>
    %63 = arith.subf %59, %62 : vector<4x8x8xf32>
    %64 = math.exp %63 : vector<4x8x8xf32>
    %cst_22 = arith.constant dense<0.000000e+00> : vector<4x8xf32>
    %65 = vector.multi_reduction <add>, %64, %cst_22 [2] : vector<4x8x8xf32> to vector<4x8xf32>
    %66 = vector.shape_cast %65 : vector<4x8xf32> to vector<4x8x1xf32>
    %67 = tpu.reciprocal %66 {approx = true} : vector<4x8x1xf32> -> vector<4x8x1xf32>
    %68 = vector.broadcast %67 : vector<4x8x1xf32> to vector<4x8x8xf32>
    %69 = arith.mulf %64, %68 : vector<4x8x8xf32>
    %70 = arith.truncf %69 : vector<4x8x8xf32> to vector<4x8x8xbf16>
    %71 = arith.truncf %43 : vector<4x8x8xf32> to vector<4x8x8xbf16>
    "tpu.trace_start"() <{level = 10 : i32, message = "hqk,hkd->hqd"}> : () -> ()
    %cst_23 = arith.constant dense<0.000000e+00> : vector<4x8x8xf32>
    %72 = tpu.matmul %70, %71, %cst_23 {dimension_numbers = #tpu.dot_dimension_numbers<[2], [1], [1], [2], [0, 0, 0, 1, 1, 2], [0], [0]>} : vector<4x8x8xbf16>, vector<4x8x8xbf16>, vector<4x8x8xf32> -> vector<4x8x8xf32>
    "tpu.trace_stop"() : () -> ()
    %73 = vector.extract_strided_slice %72 {offsets = [0, 0, 0], sizes = [1, 8, 8], strides = [1, 1, 1]} : vector<4x8x8xf32> to vector<1x8x8xf32>
    %74 = vector.shape_cast %73 : vector<1x8x8xf32> to vector<8x8xf32>
    %75 = vector.extract_strided_slice %72 {offsets = [1, 0, 0], sizes = [1, 8, 8], strides = [1, 1, 1]} : vector<4x8x8xf32> to vector<1x8x8xf32>
    %76 = vector.shape_cast %75 : vector<1x8x8xf32> to vector<8x8xf32>
    %77 = vector.extract_strided_slice %72 {offsets = [2, 0, 0], sizes = [1, 8, 8], strides = [1, 1, 1]} : vector<4x8x8xf32> to vector<1x8x8xf32>
    %78 = vector.shape_cast %77 : vector<1x8x8xf32> to vector<8x8xf32>
    %79 = vector.extract_strided_slice %72 {offsets = [3, 0, 0], sizes = [1, 8, 8], strides = [1, 1, 1]} : vector<4x8x8xf32> to vector<1x8x8xf32>
    %80 = vector.shape_cast %79 : vector<1x8x8xf32> to vector<8x8xf32>
    %81 = tpu.concatenate %74, %76, %78, %80 in 1 : vector<8x8xf32>, vector<8x8xf32>, vector<8x8xf32>, vector<8x8xf32> -> vector<8x32xf32>
    %82 = arith.truncf %81 : vector<8x32xf32> to vector<8x32xbf16>
    %c0_24 = arith.constant 0 : index
    %c0_25 = arith.constant 0 : index
    %83 = vector.load %arg7[%c0_24, %c0_25] : memref<32x32xbf16, #tpu.memory_space<vmem>>, vector<32x32xbf16>
    %cst_26 = arith.constant dense<0.000000e+00> : vector<8x32xf32>
    %84 = tpu.matmul %82, %83, %cst_26 {dimension_numbers = #tpu.dot_dimension_numbers<[1], [0], [0], [1], [0, 0, 1, 1], [], []>} : vector<8x32xbf16>, vector<32x32xbf16>, vector<8x32xf32> -> vector<8x32xf32>
    %c0_27 = arith.constant 0 : index
    %c0_28 = arith.constant 0 : index
    %85 = vector.load %arg8[%c0_27, %c0_28] : memref<1x32xf32, #tpu.memory_space<vmem>>, vector<1x32xf32>
    %86 = vector.broadcast %85 : vector<1x32xf32> to vector<8x32xf32>
    %87 = arith.addf %84, %86 : vector<8x32xf32>
    %88 = arith.addf %1, %87 : vector<8x32xf32>
    %c0_29 = arith.constant 0 : index
    %c0_30 = arith.constant 0 : index
    %89 = vector.load %arg9[%c0_29, %c0_30] : memref<1x32xf32, #tpu.memory_space<vmem>>, vector<1x32xf32>
    %c0_31 = arith.constant 0 : index
    %c0_32 = arith.constant 0 : index
    %90 = vector.load %arg10[%c0_31, %c0_32] : memref<1x32xf32, #tpu.memory_space<vmem>>, vector<1x32xf32>
    %cst_33 = arith.constant dense<0.000000e+00> : vector<8xf32>
    %91 = vector.multi_reduction <add>, %88, %cst_33 [1] : vector<8x32xf32> to vector<8xf32>
    %92 = vector.shape_cast %91 : vector<8xf32> to vector<8x1xf32>
    %cst_34 = arith.constant 3.200000e+01 : f32
    %93 = vector.broadcast %cst_34 : f32 to vector<8x1xf32>
    %94 = arith.divf %92, %93 : vector<8x1xf32>
    %95 = vector.broadcast %94 : vector<8x1xf32> to vector<8x32xf32>
    %96 = arith.subf %88, %95 : vector<8x32xf32>
    %97 = arith.mulf %96, %96 : vector<8x32xf32>
    %cst_35 = arith.constant dense<0.000000e+00> : vector<8xf32>
    %98 = vector.multi_reduction <add>, %97, %cst_35 [1] : vector<8x32xf32> to vector<8xf32>
    %99 = vector.shape_cast %98 : vector<8xf32> to vector<8x1xf32>
    %cst_36 = arith.constant 3.200000e+01 : f32
    %100 = vector.broadcast %cst_36 : f32 to vector<8x1xf32>
    %101 = arith.divf %99, %100 : vector<8x1xf32>
    %102 = vector.broadcast %94 : vector<8x1xf32> to vector<8x32xf32>
    %103 = arith.subf %88, %102 : vector<8x32xf32>
    %cst_37 = arith.constant 9.99999974E-6 : f32
    %104 = vector.broadcast %cst_37 : f32 to vector<8x1xf32>
    %105 = arith.addf %101, %104 : vector<8x1xf32>
    %106 = math.rsqrt %105 : vector<8x1xf32>
    %107 = vector.broadcast %106 : vector<8x1xf32> to vector<8x32xf32>
    %108 = arith.mulf %103, %107 : vector<8x32xf32>
    %109 = vector.broadcast %89 : vector<1x32xf32> to vector<8x32xf32>
    %110 = arith.mulf %108, %109 : vector<8x32xf32>
    %111 = vector.broadcast %90 : vector<1x32xf32> to vector<8x32xf32>
    %112 = arith.addf %110, %111 : vector<8x32xf32>
    %113 = arith.truncf %112 : vector<8x32xf32> to vector<8x32xbf16>
    %c0_38 = arith.constant 0 : index
    %c0_39 = arith.constant 0 : index
    %114 = vector.load %arg11[%c0_38, %c0_39] : memref<32x128xbf16, #tpu.memory_space<vmem>>, vector<32x128xbf16>
    %cst_40 = arith.constant dense<0.000000e+00> : vector<8x128xf32>
    %115 = tpu.matmul %113, %114, %cst_40 {dimension_numbers = #tpu.dot_dimension_numbers<[1], [0], [0], [1], [0, 0, 1, 1], [], []>} : vector<8x32xbf16>, vector<32x128xbf16>, vector<8x128xf32> -> vector<8x128xf32>
    %c0_41 = arith.constant 0 : index
    %c0_42 = arith.constant 0 : index
    %116 = vector.load %arg12[%c0_41, %c0_42] : memref<1x128xf32, #tpu.memory_space<vmem>>, vector<1x128xf32>
    %117 = vector.broadcast %116 : vector<1x128xf32> to vector<8x128xf32>
    %118 = arith.addf %115, %117 : vector<8x128xf32>
    %cst_43 = arith.constant 5.000000e-01 : f32
    %119 = vector.broadcast %cst_43 : f32 to vector<8x128xf32>
    %120 = arith.mulf %119, %118 : vector<8x128xf32>
    %cst_44 = arith.constant 4.471500e-02 : f32
    %121 = vector.broadcast %cst_44 : f32 to vector<8x128xf32>
    %122 = arith.mulf %121, %118 : vector<8x128xf32>
    %123 = arith.mulf %122, %118 : vector<8x128xf32>
    %124 = arith.mulf %123, %118 : vector<8x128xf32>
    %125 = arith.addf %118, %124 : vector<8x128xf32>
    %cst_45 = arith.constant 0.797884583 : f32
    %126 = vector.broadcast %cst_45 : f32 to vector<8x128xf32>
    %127 = arith.mulf %126, %125 : vector<8x128xf32>
    %128 = math.tanh %127 : vector<8x128xf32>
    %cst_46 = arith.constant 1.000000e+00 : f32
    %129 = vector.broadcast %cst_46 : f32 to vector<8x128xf32>
    %130 = arith.addf %129, %128 : vector<8x128xf32>
    %131 = arith.mulf %120, %130 : vector<8x128xf32>
    %132 = arith.truncf %131 : vector<8x128xf32> to vector<8x128xbf16>
    %c0_47 = arith.constant 0 : index
    %c0_48 = arith.constant 0 : index
    %133 = vector.load %arg13[%c0_47, %c0_48] : memref<128x32xbf16, #tpu.memory_space<vmem>>, vector<128x32xbf16>
    %cst_49 = arith.constant dense<0.000000e+00> : vector<8x32xf32>
    %134 = tpu.matmul %132, %133, %cst_49 {dimension_numbers = #tpu.dot_dimension_numbers<[1], [0], [0], [1], [0, 0, 1, 1], [], []>} : vector<8x128xbf16>, vector<128x32xbf16>, vector<8x32xf32> -> vector<8x32xf32>
    %c0_50 = arith.constant 0 : index
    %c0_51 = arith.constant 0 : index
    %135 = vector.load %arg14[%c0_50, %c0_51] : memref<1x32xf32, #tpu.memory_space<vmem>>, vector<1x32xf32>
    %136 = vector.broadcast %135 : vector<1x32xf32> to vector<8x32xf32>
    %137 = arith.addf %134, %136 : vector<8x32xf32>
    %138 = arith.addf %88, %137 : vector<8x32xf32>
    %c0_52 = arith.constant 0 : index
    %c0_53 = arith.constant 0 : index
    %c0_54 = arith.constant 0 : index
    %139 = vector.load %arg15[%c0_52, %c0_53, %c0_54] : memref<1x8x32xf32, #tpu.memory_space<vmem>>, vector<1x8x32xf32>
    %140 = vector.shape_cast %139 : vector<1x8x32xf32> to vector<8x32xf32>
    %141 = vector.shape_cast %138 : vector<8x32xf32> to vector<1x8x32xf32>
    tpu.vector_store %arg15[%c0_52, %c0_53, %c0_54], %141 {strides = array<i32>} : memref<1x8x32xf32, #tpu.memory_space<vmem>>, vector<1x8x32xf32>,
    return
  }
  func.func @transform_0(%arg0: i32) -> (i32, i32, i32) {
    %c0_i32 = arith.constant 0 : i32
    %c0_i32_0 = arith.constant 0 : i32
    %c0_i32_1 = arith.constant 0 : i32
    return %arg0, %c0_i32, %c0_i32_0 : i32, i32, i32
  }
  func.func @transform_1(%arg0: i32) -> (i32, i32, i32) {
    %c0_i32 = arith.constant 0 : i32
    %c0_i32_0 = arith.constant 0 : i32
    %c0_i32_1 = arith.constant 0 : i32
    return %arg0, %c0_i32, %c0_i32_0 : i32, i32, i32
  }
  func.func @transform_2(%arg0: i32) -> (i32, i32) {
    %c0_i32 = arith.constant 0 : i32
    %c0_i32_0 = arith.constant 0 : i32
    %c0_i32_1 = arith.constant 0 : i32
    return %c0_i32, %c0_i32_0 : i32, i32
  }
  func.func @transform_3(%arg0: i32) -> (i32, i32) {
    %c0_i32 = arith.constant 0 : i32
    %c0_i32_0 = arith.constant 0 : i32
    %c0_i32_1 = arith.constant 0 : i32
    return %c0_i32, %c0_i32_0 : i32, i32
  }
  func.func @transform_4(%arg0: i32) -> (i32, i32) {
    %c0_i32 = arith.constant 0 : i32
    %c0_i32_0 = arith.constant 0 : i32
    %c0_i32_1 = arith.constant 0 : i32
    return %c0_i32, %c0_i32_0 : i32, i32
  }
  func.func @transform_5(%arg0: i32) -> (i32, i32) {
    %c0_i32 = arith.constant 0 : i32
    %c0_i32_0 = arith.constant 0 : i32
    %c0_i32_1 = arith.constant 0 : i32
    return %c0_i32, %c0_i32_0 : i32, i32
  }
  func.func @transform_6(%arg0: i32) -> (i32, i32) {
    %c0_i32 = arith.constant 0 : i32
    %c0_i32_0 = arith.constant 0 : i32
    %c0_i32_1 = arith.constant 0 : i32
    return %c0_i32, %c0_i32_0 : i32, i32
  }
  func.func @transform_7(%arg0: i32) -> (i32, i32) {
    %c0_i32 = arith.constant 0 : i32
    %c0_i32_0 = arith.constant 0 : i32
    %c0_i32_1 = arith.constant 0 : i32
    return %c0_i32, %c0_i32_0 : i32, i32
  }
  func.func @transform_8(%arg0: i32) -> (i32, i32) {
    %c0_i32 = arith.constant 0 : i32
    %c0_i32_0 = arith.constant 0 : i32
    %c0_i32_1 = arith.constant 0 : i32
    return %c0_i32, %c0_i32_0 : i32, i32
  }
  func.func @transform_9(%arg0: i32) -> (i32, i32) {
    %c0_i32 = arith.constant 0 : i32
    %c0_i32_0 = arith.constant 0 : i32
    %c0_i32_1 = arith.constant 0 : i32
    return %c0_i32, %c0_i32_0 : i32, i32
  }
  func.func @transform_10(%arg0: i32) -> (i32, i32) {
    %c0_i32 = arith.constant 0 : i32
    %c0_i32_0 = arith.constant 0 : i32
    %c0_i32_1 = arith.constant 0 : i32
    return %c0_i32, %c0_i32_0 : i32, i32
  }
  func.func @transform_11(%arg0: i32) -> (i32, i32) {
    %c0_i32 = arith.constant 0 : i32
    %c0_i32_0 = arith.constant 0 : i32
    %c0_i32_1 = arith.constant 0 : i32
    return %c0_i32, %c0_i32_0 : i32, i32
  }
  func.func @transform_12(%arg0: i32) -> (i32, i32) {
    %c0_i32 = arith.constant 0 : i32
    %c0_i32_0 = arith.constant 0 : i32
    %c0_i32_1 = arith.constant 0 : i32
    return %c0_i32, %c0_i32_0 : i32, i32
  }
  func.func @transform_13(%arg0: i32) -> (i32, i32) {
    %c0_i32 = arith.constant 0 : i32
    %c0_i32_0 = arith.constant 0 : i32
    %c0_i32_1 = arith.constant 0 : i32
    return %c0_i32, %c0_i32_0 : i32, i32
  }
  func.func @transform_14(%arg0: i32) -> (i32, i32, i32) {
    %c0_i32 = arith.constant 0 : i32
    %c0_i32_0 = arith.constant 0 : i32
    %c0_i32_1 = arith.constant 0 : i32
    return %arg0, %c0_i32, %c0_i32_0 : i32, i32, i32
  }
}

</mosaic_0001>

<bundles_post_ra>
// kernel: gpt2_block.1
= control target key start
LH: loop header
LB: loop body
LE: loop exit
PB: predicated region body
PF: predicated region fallthrough
CT: control target
= control target key end

     0   :  { %s1662_s0 = inlined_call_operand.vmem [shape: f32[2,8,32], index: 0, kind: input, shape index: {}]   ;;  %s1663_s1 = inlined_call_operand.vmem [shape: f32[2,1,8], index: 1, kind: input, shape index: {}]   ;;  %s1664_s2 = inlined_call_operand.vmem [shape: f32[1,32], index: 2, kind: input, shape index: {}]   ;;  %s1665_s3 = inlined_call_operand.vmem [shape: f32[1,32], index: 3, kind: input, shape index: {}]   ;;  %s1666_s4 = inlined_call_operand.vmem [shape: bf16[32,96], index: 4, kind: input, shape index: {}]   ;;  %s1667_s5 = inlined_call_operand.vmem [shape: f32[1,96], index: 5, kind: input, shape index: {}]   ;;  %s1668_s6 = inlined_call_operand.vmem [shape: bf16[32,32], index: 6, kind: input, shape index: {}]   ;;  %s1669_s7 = inlined_call_operand.vmem [shape: f32[1,32], index: 7, kind: input, shape index: {}]   ;;  %s1670_s8 = inlined_call_operand.vmem [shape: f32[1,32], index: 8, kind: input, shape index: {}]   ;;  %s1671_s9 = inlined_call_operand.vmem [shape: f32[1,32], index: 9, kind: input, shape index: {}]   ;;  %s1672_s10 = inlined_call_operand.vmem [shape: bf16[32,128], index: 10, kind: input, shape index: {}]   ;;  %s1673_s11 = inlined_call_operand.vmem [shape: f32[1,128], index: 11, kind: input, shape index: {}]   ;;  %s1674_s12 = inlined_call_operand.vmem [shape: bf16[128,32], index: 12, kind: input, shape index: {}]   ;;  %s1675_s13 = inlined_call_operand.vmem [shape: f32[1,32], index: 13, kind: input, shape index: {}]   ;;  %s1676_s14 = inlined_call_operand.hbm [shape: f32[2,8,32], index: 14, kind: output, shape index: {}]  }
   0x1   :  { %1677 = sst [smem:[#allocation6_spill]] %s1662_s0 }
   0x2   :  { %1678 = sst [smem:[#allocation7_spill]] %s1663_s1 }
   0x3   :  { %1679 = sst [smem:[#allocation8_spill]] %s1664_s2 }
   0x4   :  { %1680 = sst [smem:[#allocation9_spill]] %s1665_s3 }
   0x5   :  { %19 = vsyncpa [#allocation3], 0 }
   0x6   :  { %21 = vsyncpa [#allocation3 + $0x1], 0  ;;  %s1434_s29 = smov 0   ;;  %s1436_s30 = smov 0  }
   0x7   :  { %s1438_s15 = smov 0   ;;  %s1440_s16 = smov 0  }
   0x8 LB: > { %s1455_s17 = sadd.s32 4294967295, %s1347_s16   ;;  %s1112_s18 = sadd.s32 4294967294, %s1347_s16   ;;  %s1347_s16 = sphi %s1440_s16, %s1693_s16   ;;  %s1343_s15 = sphi %s1438_s15, %s1692_s15   ;;  %s1339_s30 = sphi %s1436_s30, %s1691_s30   ;;  %s1335_s29 = sphi %s1434_s29, %s1690_s29  }
   0x9   : > { %s1459_s19 = sadd.s32 1, %s1347_s16   ;;  %s338_s20 = sadd.s32 1, %s1343_s15 }
   0xa   : > { %s335_s21 = ssub.s32 %s1347_s16, %s1459_s19  ;;  %p348_p0 = scmp.ne.s32.totalorder %s1343_s15, %s1339_s30 }
   0xb   : > { %p336_p1 = scmp.eq.s32.totalorder %s335_s21, 0  ;;  %p349_p2 = scmp.eq.s32.totalorder %s1455_s17, 1 }
   0xc   : > { %p354_p3 = scmp.ne.s32.totalorder %s1339_s30, %s1335_s29  ;;  %p355_p4 = scmp.eq.s32.totalorder %s1112_s18, 1 }
   0xd   : > { %s1470_s22 = scalar_select %p336_p1, %s1343_s15, %s338_s20  }
   0xe   : > { %p1472_p5 = por %p349_p2, %p348_p0  ;;  %p1476_p6 = por %p355_p4, %p354_p3 }
   0xf   : > { %1681 = sst [smem:[#allocation5_spill]] %s1470_s22  ;;  %p1115_p7 = scmp.ge.s32.totalorder %s1347_s16, 1 }
  0x10   : > { %p422_p8 = scmp.lt.s32.totalorder %s1347_s16, 3 }
  0x12   : > { %p423_p9 = pnand %p1115_p7, %p422_p8 }
  0x13   : > { %p470_p10 = scmp.lt.s32.totalorder (!%p423_p9), %s1455_s17, 1  ;;  %s1684_s1 = sld [smem:[#allocation7_spill]] (!%p423_p9) }
  0x14   : > { %426 = sbr.rel (%p423_p9) target bundleno = 1998 (0x7ce), region = 76  ;;  %s1685_s0 = sld [smem:[#allocation6_spill]] (!%p423_p9) }
  0x15   : > { %s1686_s2 = sld [smem:[#allocation8_spill]] (!%p423_p9)  ;;  %s1350_s18 = smov (!%p423_p9), 56  }
  0x16   : > { %s1687_s3 = sld [smem:[#allocation9_spill]] (!%p423_p9)  ;;  %s1351_s20 = smov (!%p423_p9), 104  }
  0x17   : > { %s1352_s21 = smov (!%p423_p9), 80   ;;  %s1355_s28 = smov (!%p423_p9), 112  }
  0x19   : > { %s1484_s25 = scalar_select %p470_p10, %s1455_s17, 1  ;;  %vm481_vm0 = vcmask 261120   ;;  %v1349_v2 = vmov 32.0   ;;  %v1190_v14 = vld [vmem:[%s1666_s4 + $0x8] sm:$0xff]  ;;  %v1189_v15 = vld [vmem:[%s1666_s4] sm:$0xff]  ;;  %vm586_vm5 = vcmask 64512   ;;  %v566_v59 = vlaneseq }
  0x1a   : > { %1261 = vrcp.f32 %v1349_v2  ;;  %549 = vmatpush.bf16.msra.mxu0 %v1190_v14  ;;  %v1255_v32 = vld [vmem:[%s1667_s5] ss:$0 sm:$0xff]  ;;  %v1354_v63 = vmov -1e+09   ;;  %vm731_vm7 = vcmask 1043456   ;;  %vm824_vm8 = vcmask 130048  }
  0x1b   : > { %s1117_s26 = sshll.u32 %s1484_s25, 3  ;;  %v1253_v25 = vld [vmem:[%s1686_s2] ss:$0 sm:$0xff]  ;;  %v567_v60 = vshrl.u32 %v566_v59, 7  ;;  %v569_v61 = vand.u32 127, %v566_v59  ;;  %s1688_s27 = scalar_lea.vmem %s1684_s1, %s1484_s25  ;;  %vm826_vm9 = vcmask 195584  }
  0x1c   : > { %s473_s22 = scalar_lea.vmem %s1685_s0, %s1117_s26  ;;  %v1254_v28 = vld [vmem:[%s1687_s3] ss:$0 sm:$0xff]  ;;  %s1356_s25 = smov 8  }
  0x1d   : > { %v1494_v0 = vld [vmem:[%s473_s22] sm:$0xff]  ;;  %s1353_s22 = smov 120   ;;  %vm570_vm6 = vcmp.ge.s32.totalorder %v567_v60, %v569_v61  ;;  %s467_s0 = sand.u32 1, %s1339_s30  }
  0x1e   : > { %v482_v1 = vsel %vm481_vm0, %v1494_v0, 0.0  ;;  %550 = vmatpush.bf16.msra.mxu0 %v1189_v15  ;;  %v1252_v62 = vld [vmem:[%s1688_s27] ss:$0 sm:$0xff]  ;;  %s1116_s1 = sshll.u32 %s467_s0, 3 }
  0x1f   : > { %483 = vadd.xlane.f32.xlu0 %v482_v1  ;;  %v571_v1 = vsel %vm570_vm6, 0.0, %v1354_v63 }
  0x20   : > { %v1262_v3 = vpop.eup %1261  ;;  %v576_v2 = vadd.f32 %v1252_v62, %v571_v1 }
  0x21   : > { %v486_v4 = vmul.f32 32.0, %v1262_v3  ;;  %vm490_vm1 = vweird.f32 %v1262_v3 }
  0x23   : > { %v487_v5 = vsub.f32 1.0, %v486_v4 }
  0x25   : > { %v488_v6 = vmul.f32 %v1262_v3, %v487_v5 }
  0x27   : > { %v489_v7 = vadd.f32 %v1262_v3, %v488_v6 }
  0x29   : > { %v1498_v8 = vsel %vm490_vm1, %v1262_v3, %v489_v7 }
  0x92   : > { %v484_v9 = vpop.xlane.xlu0 %483 }
  0x93   : > { %v492_v10 = vmul.f32 %v1498_v8, %v484_v9 }
  0x95   : > { %v493_v11 = vsub.f32 %v1494_v0, %v492_v10 }
  0x97   : > { %v494_v12 = vmul.f32 %v493_v11, %v493_v11 }
  0x99   : > { %v495_v13 = vsel %vm481_vm0, %v494_v12, 0.0 }
  0x9a   : > { %496 = vadd.xlane.f32.xlu0 %v495_v13 }
 0x10d   : > { %v497_v16 = vpop.xlane.xlu0 %496 }
 0x10e   : > { %v498_v17 = vmul.f32 %v497_v16, %v1498_v8 }
 0x110   : > { %v499_v18 = vadd.f32 1e-05, %v498_v17 }
 0x112   : > { %1263 = vrsqrt.f32 %v499_v18  ;;  %vm506_vm3 = vweird.f32 %v499_v18 }
 0x118   : > { %v1264_v19 = vpop.eup %1263 }
 0x119   : > { %v501_v20 = vmul.f32 %v1264_v19, %v499_v18  ;;  %vm507_vm2 = vweird.f32 %v1264_v19 }
 0x11a   : > { %vm508_vm4 = vmor %vm506_vm3, %vm507_vm2 }
 0x11b   : > { %v502_v21 = vmul.f32 %v1264_v19, %v501_v20 }
 0x11d   : > { %v503_v22 = vmul.f32 0.5, %v502_v21 }
 0x11f   : > { %v504_v23 = vsub.f32 1.5, %v503_v22 }
 0x121   : > { %v505_v24 = vmul.f32 %v1264_v19, %v504_v23 }
 0x123   : > { %v509_v26 = vsel %vm508_vm4, %v1264_v19, %v505_v24 }
 0x124   : > { %v510_v27 = vmul.f32 %v509_v26, %v493_v11 }
 0x126   : > { %v514_v29 = vmul.f32 %v1253_v25, %v510_v27 }
 0x128   : > { %v518_v30 = vadd.f32 %v1254_v28, %v514_v29 }
 0x12a   : > { %v519_v31 = vpack.c.bf16 %v518_v30, %v518_v30 }
 0x12c   : > { %1126 = vmatmul.msk.bf16.vlgmr.msra.gmra.mxu0 %vm481_vm0, %v519_v31 }
 0x1a9   : > { %v552_v33 = vpop.f32.mrf.mxu0 }
 0x1aa   : > { %v553_v34 = vadd.f32 %v1255_v32, %v552_v33 }
 0x1ac   : > { %563 = vrot.lane.b32.xlu2 %v553_v34, %s1350_s18  ;;  %557 = vrot.lane.b32.xlu1 %v553_v34, %s1351_s20  ;;  %v577_v44 = vpack.c.bf16 %v553_v34, %v553_v34  ;;  %s1357_s20 = smov 24  }
 0x1ae   : > { %v582_v47 = vunpack.c.l.b16 %v577_v44 }
 0x1b0   : > { %v1525_v50 = vpack.c.b16 %v582_v47, %v582_v47 }
 0x1b1   : > { %v554_v35 = vpop.f32.mrf.mxu0 }
 0x1b4   : > { %560 = vrot.lane.b32.xlu1 %v553_v34, %s1352_s21  ;;  %s1358_s21 = smov 16  }
 0x206   : > { %v564_v36 = vpop.permute.xlu2 %563 }
 0x207   : > { %v580_v37 = vpack.c.bf16 %v564_v36, %v564_v36 }
 0x209   : > { %v655_v38 = vunpack.c.l.b16 %v580_v37 }
 0x20b   : > { %v1520_v39 = vpack.c.b16 %v655_v38, %v655_v38 }
 0x20d   : > { %657 = vrot.lane.b32.xlu1 %v1520_v39, %s1353_s22 }
 0x21e   : > { %v558_v40 = vpop.permute.xlu1 %557 }
 0x21f   : > { %v578_v41 = vpack.c.bf16 %v558_v40, %v558_v40 }
 0x221   : > { %v607_v42 = vunpack.c.l.b16 %v578_v41 }
 0x223   : > { %v608_v43 = vpack.c.b16 %v607_v42, %v607_v42 }
 0x225   : > { %609 = vrot.lane.b32.xlu2 %v608_v43, %s1353_s22 }
 0x226   : > { %v561_v45 = vpop.permute.xlu1 %560 }
 0x227   : > { %v579_v46 = vpack.c.bf16 %v561_v45, %v561_v45 }
 0x229   : > { %v631_v48 = vunpack.c.l.b16 %v579_v46 }
 0x22b   : > { %v1523_v49 = vpack.c.b16 %v631_v48, %v631_v48 }
 0x22d   : > { %633 = vrot.lane.b32.xlu0 %v1523_v49, %s1353_s22  ;;  %584 = vrot.lane.b32.xlu2 %v1525_v50, %s1353_s22 }
 0x27f   : > { %v610_v51 = vpop.permute.xlu2 %609  ;;  %v658_v52 = vpop.permute.xlu1 %657 }
 0x280   : > { %v615_v53 = vsel %vm586_vm5, %v610_v51, 0  ;;  %v663_v54 = vsel %vm586_vm5, %v658_v52, 0 }
 0x281   : > { %624 = vmatpush.bf16.xpose.msra.mxu2 %v615_v53  ;;  %672 = vmatpush.bf16.xpose.msrb.mxu0 %v663_v54 }
 0x287   : > { %v585_v55 = vpop.permute.xlu2 %584 }
 0x288   : > { %1128 = vmatmul.msk.bf16.vlgmr.msra.gmra.mxu2 %vm586_vm5, %v578_v41  ;;  %1130 = vmatmul.msk.bf16.vlgmr.msrb.gmra.mxu0 %vm586_vm5, %v580_v37  ;;  %v591_v56 = vsel %vm586_vm5, %v585_v55, 0 }
 0x289   : > { %600 = vmatpush.bf16.xpose.msra.mxu1 %v591_v56 }
 0x290   : > { %1127 = vmatmul.msk.bf16.vlgmr.msra.gmra.mxu1 %vm586_vm5, %v577_v44 }
 0x29f   : > { %v634_v57 = vpop.permute.xlu0 %633 }
 0x2a0   : > { %v639_v58 = vsel %vm586_vm5, %v634_v57, 0 }
 0x2a1   : > { %648 = vmatpush.bf16.xpose.msra.mxu3 %v639_v58 }
 0x2a8   : > { %1129 = vmatmul.msk.bf16.vlgmr.msra.gmra.mxu3 %vm586_vm5, %v579_v46 }
 0x305   : > { %v674_v3 = vpop.f32.mrf.mxu0 }
 0x306   : > { %v675_v4 = vadd.f32 %v674_v3, %v576_v2 }
 0x308   : > { %v687_v5 = vsel %vm586_vm5, %v675_v4, -inf }
 0x309   : > { %688 = vmax.xlane.f32.xlu0 %v687_v5 }
 0x30b   : > { %v626_v6 = vpop.f32.mrf.mxu2 }
 0x30c   : > { %v627_v7 = vadd.f32 %v626_v6, %v576_v2 }
 0x30d   : > { %v602_v9 = vpop.f32.mrf.mxu1  ;;  %v676_v10 = vpop.f32.mrf.mxu0 }
 0x30e   : > { %v681_v11 = vsel %vm586_vm5, %v627_v7, -inf  ;;  %v603_v17 = vadd.f32 %v602_v9, %v576_v2  ;;  %v1192_v10 = vld [vmem:[%s1668_s6 + $0x8] sm:$0xff] }
 0x30f   : > { %682 = vmax.xlane.f32.xlu1 %v681_v11  ;;  %v1191_v11 = vld [vmem:[%s1668_s6] sm:$0xff] }
 0x310   : > { %v678_v19 = vsel %vm586_vm5, %v603_v17, -inf }
 0x313   : > { %v628_v12 = vpop.f32.mrf.mxu2 }
 0x315   : > { %v604_v13 = vpop.f32.mrf.mxu1 }
 0x31d   : > { %748 = vrot.lane.b32.xlu0 %v608_v43, %s1355_s28 }
 0x32b   : > { %v650_v14 = vpop.f32.mrf.mxu3 }
 0x32c   : > { %v651_v15 = vadd.f32 %v650_v14, %v576_v2 }
 0x32e   : > { %v684_v16 = vsel %vm586_vm5, %v651_v15, -inf }
 0x32f   : > { %685 = vmax.xlane.f32.xlu2 %v684_v16 }
 0x333   : > { %v652_v18 = vpop.f32.mrf.mxu3 }
 0x337   : > { %679 = vmax.xlane.f32.xlu2 %v678_v19  ;;  %v1256_v19 = vld [vmem:[%s1669_s7] ss:$0 sm:$0xff] }
 0x37c   : > { %v689_v20 = vpop.xlane.xlu0 %688 }
 0x37d   : > { %v693_v21 = vsub.f32 %v675_v4, %v689_v20 }
 0x37f   : > { %v700_v22 = vmul.f32 1.442695, %v693_v21 }
 0x381   : > { %1265 = vpow2.f32 %v700_v22 }
 0x382   : > { %v683_v23 = vpop.xlane.xlu1 %682 }
 0x383   : > { %v691_v24 = vsub.f32 %v627_v7, %v683_v23 }
 0x385   : > { %v696_v25 = vmul.f32 1.442695, %v691_v24 }
 0x387   : > { %v1266_v26 = vpop.eup %1265  ;;  %1267 = vpow2.f32 %v696_v25 }
 0x388   : > { %v711_v27 = vsel %vm586_vm5, %v1266_v26, 0.0 }
 0x389   : > { %712 = vadd.xlane.f32.xlu1 %v711_v27 }
 0x38d   : > { %v1268_v28 = vpop.eup %1267 }
 0x38e   : > { %v705_v31 = vsel %vm586_vm5, %v1268_v28, 0.0 }
 0x38f   : > { %v749_v29 = vpop.permute.xlu0 %748 }
 0x390   : > { %v754_v30 = vsel %vm731_vm7, %v749_v29, 0 }
 0x391   : > { %763 = vmatpush.bf16.msrb.mxu2 %v754_v30  ;;  %706 = vadd.xlane.f32.xlu1 %v705_v31  ;;  %v1194_v30 = vld [vmem:[%s1672_s10 + $0x8] sm:$0xff]  ;;  %v1202_v31 = vld [vmem:[%s1674_s12 + $0x38] sm:$0xff] }
 0x395   : > { %928 = vmatpush.bf16.msra.mxu2 %v1194_v30 }
 0x3a2   : > { %v686_v32 = vpop.xlane.xlu2 %685 }
 0x3a3   : > { %v692_v33 = vsub.f32 %v651_v15, %v686_v32 }
 0x3a5   : > { %v698_v34 = vmul.f32 1.442695, %v692_v33 }
 0x3a7   : > { %1269 = vpow2.f32 %v698_v34  ;;  %v1201_v34 = vld [vmem:[%s1674_s12 + $0x30] sm:$0xff] }
 0x3aa   : > { %790 = vrot.lane.b32.xlu1 %v1520_v39, %s1355_s28  ;;  %v680_v35 = vpop.xlane.xlu2 %679 }
 0x3ab   : > { %v690_v36 = vsub.f32 %v603_v17, %v680_v35 }
 0x3ad   : > { %v1270_v37 = vpop.eup %1269  ;;  %v694_v38 = vmul.f32 1.442695, %v690_v36 }
 0x3ae   : > { %v708_v40 = vsel %vm586_vm5, %v1270_v37, 0.0 }
 0x3af   : > { %1271 = vpow2.f32 %v694_v38  ;;  %709 = vadd.xlane.f32.xlu2 %v708_v40 }
 0x3b5   : > { %v1272_v41 = vpop.eup %1271 }
 0x3b6   : > { %v702_v42 = vsel %vm586_vm5, %v1272_v41, 0.0 }
 0x3b7   : > { %703 = vadd.xlane.f32.xlu0 %v702_v42 }
 0x3c7   : > { %769 = vrot.lane.b32.xlu2 %v1523_v49, %s1355_s28 }
 0x3cf   : > { %726 = vrot.lane.b32.xlu2 %v1525_v50, %s1355_s28  ;;  %s469_s28 = scalar_lea.vmem [#allocation2], %s1116_s1  ;;  %s1305_s1 = scalar_lea.hbm %s1676_s14, 16 }
 0x3fc   : > { %v713_v43 = vpop.xlane.xlu1 %712 }
 0x404   : > { %v707_v39 = vpop.xlane.xlu1 %706 }
 0x405   : > { %1273 = vrcp.f32 %v707_v39 }
 0x406   : > { %1275 = vrcp.f32 %v713_v43 }
 0x40b   : > { %v1274_v44 = vpop.eup %1273 }
 0x40c   : > { %v719_v45 = vmul.f32 %v1274_v44, %v1268_v28  ;;  %v1276_v47 = vpop.eup %1275  ;;  %v1258_v44 = vld [vmem:[%s1671_s9] ss:$0 sm:$0xff] }
 0x40d   : > { %v721_v48 = vmul.f32 %v1276_v47, %v1266_v26 }
 0x40e   : > { %v723_v46 = vpack.c.bf16 %v719_v45, %v719_v45 }
 0x40f   : > { %v725_v53 = vpack.c.bf16 %v721_v48, %v721_v48  ;;  %v1200_v48 = vld [vmem:[%s1674_s12 + $0x28] sm:$0xff] }
 0x410   : > { %1132 = vmatmul.msk.bf16.vlgmr.msrb.gmra.mxu2 %vm586_vm5, %v723_v46 }
 0x41c   : > { %v791_v51 = vpop.permute.xlu1 %790 }
 0x41d   : > { %v796_v52 = vsel %vm731_vm7, %v791_v51, 0  ;;  %v1199_v51 = vld [vmem:[%s1674_s12 + $0x20] sm:$0xff] }
 0x41e   : > { %805 = vmatpush.bf16.msra.mxu0 %v796_v52  ;;  %v1198_v52 = vld [vmem:[%s1674_s12 + $0x18] sm:$0xff] }
 0x421   : > { %1134 = vmatmul.msk.bf16.vlgmr.msra.gmra.mxu0 %vm586_vm5, %v725_v53  ;;  %v1197_v53 = vld [vmem:[%s1674_s12 + $0x10] sm:$0xff] }
 0x422   : > { %v710_v49 = vpop.xlane.xlu2 %709 }
 0x423   : > { %1277 = vrcp.f32 %v710_v49  ;;  %v1196_v49 = vld [vmem:[%s1674_s12 + $0x8] sm:$0xff] }
 0x429   : > { %v1278_v50 = vpop.eup %1277 }
 0x42a   : > { %v720_v54 = vmul.f32 %v1278_v50, %v1270_v37  ;;  %v704_v55 = vpop.xlane.xlu0 %703  ;;  %v770_v56 = vpop.permute.xlu2 %769  ;;  %v1195_v50 = vld [vmem:[%s1674_s12] sm:$0xff] }
 0x42b   : > { %1279 = vrcp.f32 %v704_v55  ;;  %v775_v57 = vsel %vm731_vm7, %v770_v56, 0 }
 0x42c   : > { %784 = vmatpush.bf16.msrb.mxu3 %v775_v57  ;;  %v724_v58 = vpack.c.bf16 %v720_v54, %v720_v54  ;;  %v1259_v54 = vld [vmem:[%s1673_s11] ss:$0 sm:$0xff] }
 0x42f   : > { %1133 = vmatmul.msk.bf16.vlgmr.msrb.gmra.mxu3 %vm586_vm5, %v724_v58 }
 0x430   : > { %1013 = vmatpush.bf16.msra.mxu3 %v1202_v31 }
 0x431   : > { %v1280_v59 = vpop.eup %1279 }
 0x432   : > { %v718_v60 = vmul.f32 %v1280_v59, %v1272_v41  ;;  %v727_v61 = vpop.permute.xlu2 %726 }
 0x433   : > { %v733_v62 = vsel %vm731_vm7, %v727_v61, 0 }
 0x434   : > { %v722_v63 = vpack.c.bf16 %v718_v60, %v718_v60  ;;  %742 = vmatpush.bf16.msrb.mxu1 %v733_v62  ;;  %1014 = vmatpush.bf16.msra.mxu3 %v1201_v34 }
 0x437   : > { %1131 = vmatmul.msk.bf16.vlgmr.msrb.gmra.mxu1 %vm586_vm5, %v722_v63 }
 0x438   : > { %858 = vmatpush.bf16.msra.mxu1 %v1192_v10  ;;  %1015 = vmatpush.bf16.msra.mxu3 %v1200_v48 }
 0x43c   : > { %859 = vmatpush.bf16.msra.mxu1 %v1191_v11  ;;  %1016 = vmatpush.bf16.msra.mxu3 %v1199_v51 }
 0x440   : > { %1017 = vmatpush.bf16.msra.mxu3 %v1198_v52 }
 0x444   : > { %1018 = vmatpush.bf16.msra.mxu3 %v1197_v53 }
 0x448   : > { %1019 = vmatpush.bf16.msra.mxu3 %v1196_v49 }
 0x44c   : > { %1020 = vmatpush.bf16.msra.mxu3 %v1195_v50 }
 0x493   : > { %v765_v1 = vpop.f32.mrf.mxu2 }
 0x494   : > { %812 = vrot.lane.b32.xlu1 %v765_v1, %s1356_s25  ;;  %s1041_s25 = sshll.u32 %s469_s28, 4  ;;  %s1042_s25 = int_to_ptr.vmem [resolvable:$true] %s1041_s25 }
 0x49b   : > { %v767_v2 = vpop.f32.mrf.mxu2 }
 0x49e   : > { %v807_v3 = vpop.f32.mrf.mxu0 }
 0x49f   : > { %820 = vrot.lane.b32.xlu1 %v807_v3, %s1357_s20  ;;  %s1186_s20 = sshll.u32 %s1455_s17, 3  ;;  %s1029_s17 = scalar_lea.sflag [#allocation3], %s467_s0 }
 0x4a0   : > { %s1039_s27 = scalar_lea.hbm %s1676_s14, %s1186_s20 }
 0x4a1   : > { %s1043_s2 = sshll.u32 %s1039_s27, 4  ;;  %s1044_s2 = int_to_ptr.hbm [resolvable:$true] %s1043_s2 }
 0x4a2   : > { %s1299_s3 = sshra.s32 %s1044_s2, 4  ;;  %s1300_s3 = int_to_ptr.hbm [resolvable:$true] %s1299_s3 }
 0x4a3   : > { %p1306_p0 = scmp.lt.s32.totalorder %s1300_s3, %s1676_s14 }
 0x4a6   : > { %v809_v4 = vpop.f32.mrf.mxu0 }
 0x4b2   : > { %v786_v5 = vpop.f32.mrf.mxu3 }
 0x4b3   : > { %816 = vrot.lane.b32.xlu2 %v786_v5, %s1358_s21  ;;  %v1260_v5 = vld [vmem:[%s1675_s13] ss:$0 sm:$0xff]  ;;  %s1301_s21 = scalar_lea.hbm %s1300_s3, 8 }
 0x4b4   : > { %v744_v6 = vpop.f32.mrf.mxu1  ;;  %p1302_p11 = scmp.ne.s32.totalorder %s1300_s3, %s1301_s21  ;;  %p1307_p1 = scmp.lt.s32.totalorder %s1305_s1, %s1301_s21 }
 0x4b6   : > { %p1303_p12 = pnand %p1302_p11, %p1472_p5  ;;  %p1308_p2 = por %p1307_p1, %p1306_p0 }
 0x4b8   : > { %p1304_p13 = pneg %p1303_p12 }
 0x4ba   : > { %v788_v7 = vpop.f32.mrf.mxu3  ;;  %p1309_p3 = pnand %p1308_p2, %p1304_p13 }
 0x4bc   : > { %v746_v9 = vpop.f32.mrf.mxu1 }
 0x506   : > { %v813_v12 = vpop.permute.xlu1 %812 }
 0x507   : > { %v823_v14 = vsel %vm586_vm5, %v744_v6, %v813_v12 }
 0x50d   : > { %v817_v13 = vpop.permute.xlu2 %816 }
 0x50e   : > { %v825_v15 = vsel %vm824_vm8, %v823_v14, %v817_v13 }
 0x511   : > { %v821_v16 = vpop.permute.xlu1 %820 }
 0x512   : > { %v827_v17 = vsel %vm826_vm9, %v825_v15, %v821_v16 }
 0x513   : > { %v828_v18 = vpack.c.bf16 %v827_v17, %v827_v17 }
 0x515   : > { %1143 = vmatmul.msk.bf16.vlgmr.msra.gmra.mxu1 %vm481_vm0, %v828_v18 }
 0x592   : > { %v861_v20 = vpop.f32.mrf.mxu1 }
 0x593   : > { %v862_v21 = vadd.f32 %v1256_v19, %v861_v20 }
 0x595   : > { %v1577_v22 = vadd.f32 %v862_v21, %v1494_v0  ;;  %v1193_v0 = vld [vmem:[%s1672_s10] sm:$0xff] }
 0x596   : > { %929 = vmatpush.bf16.msra.mxu2 %v1193_v0 }
 0x597   : > { %v868_v23 = vsel %vm481_vm0, %v1577_v22, 0.0 }
 0x598   : > { %869 = vadd.xlane.f32.xlu2 %v868_v23 }
 0x59a   : > { %v863_v24 = vpop.f32.mrf.mxu1 }
 0x60b   : > { %v870_v25 = vpop.xlane.xlu2 %869 }
 0x60c   : > { %v871_v26 = vmul.f32 %v870_v25, %v1498_v8 }
 0x60e   : > { %v872_v27 = vsub.f32 %v1577_v22, %v871_v26 }
 0x610   : > { %v873_v28 = vmul.f32 %v872_v27, %v872_v27 }
 0x612   : > { %v874_v29 = vsel %vm481_vm0, %v873_v28, 0.0 }
 0x613   : > { %875 = vadd.xlane.f32.xlu1 %v874_v29 }
 0x686   : > { %v876_v32 = vpop.xlane.xlu1 %875 }
 0x687   : > { %v877_v33 = vmul.f32 %v876_v32, %v1498_v8  ;;  %v1257_v8 = vld [vmem:[%s1670_s8] ss:$0 sm:$0xff] }
 0x689   : > { %v878_v35 = vadd.f32 1e-05, %v877_v33 }
 0x68b   : > { %1281 = vrsqrt.f32 %v878_v35  ;;  %vm885_vm11 = vweird.f32 %v878_v35 }
 0x691   : > { %v1282_v36 = vpop.eup %1281 }
 0x692   : > { %v880_v37 = vmul.f32 %v1282_v36, %v878_v35  ;;  %vm886_vm10 = vweird.f32 %v1282_v36 }
 0x693   : > { %vm887_vm12 = vmor %vm885_vm11, %vm886_vm10 }
 0x694   : > { %v881_v38 = vmul.f32 %v1282_v36, %v880_v37 }
 0x696   : > { %v882_v40 = vmul.f32 0.5, %v881_v38 }
 0x698   : > { %v883_v41 = vsub.f32 1.5, %v882_v40 }
 0x69a   : > { %v884_v42 = vmul.f32 %v1282_v36, %v883_v41 }
 0x69c   : > { %v888_v43 = vsel %vm887_vm12, %v1282_v36, %v884_v42 }
 0x69d   : > { %v889_v39 = vmul.f32 %v888_v43, %v872_v27 }
 0x69f   : > { %v893_v45 = vmul.f32 %v1257_v8, %v889_v39 }
 0x6a1   : > { %v897_v46 = vadd.f32 %v1258_v44, %v893_v45 }
 0x6a3   : > { %v898_v47 = vpack.c.bf16 %v897_v46, %v897_v46 }
 0x6a5   : > { %1152 = vmatmul.msk.bf16.vlgmr.msra.gmra.mxu2 %vm481_vm0, %v898_v47 }
 0x728   : > { %v931_v55 = vpop.f32.mrf.mxu2 }
 0x729   : > { %v932_v56 = vadd.f32 %v1259_v54, %v931_v55 }
 0x72b   : > { %v936_v57 = vmul.f32 0.044715, %v932_v56  ;;  %v935_v1 = vmul.f32 0.5, %v932_v56 }
 0x72d   : > { %v937_v58 = vmul.f32 %v936_v57, %v932_v56 }
 0x72f   : > { %v938_v59 = vmul.f32 %v937_v58, %v932_v56 }
 0x730   : > { %v933_v60 = vpop.f32.mrf.mxu2 }
 0x731   : > { %v939_v61 = vadd.f32 %v938_v59, %v932_v56 }
 0x733   : > { %v940_v62 = vmul.f32 0.7978846, %v939_v61 }
 0x735   : > { %1283 = vtanh.f32 %v940_v62 }
 0x73b   : > { %v1284_v63 = vpop.eup %1283 }
 0x73c   : > { %v942_v2 = vadd.f32 1.0, %v1284_v63 }
 0x73e   : > { %v943_v3 = vmul.f32 %v942_v2, %v935_v1 }
 0x740   : > { %v944_v4 = vpack.c.bf16 %v943_v3, %v943_v3 }
 0x742   : > { %1021 = vmatmul.bf16.vlgmr.msra.gmra.mxu3 %v944_v4 }
 0x7c5   : > { %v1022_v6 = vpop.f32.mrf.mxu3 }
 0x7c6   : > { %v1023_v7 = vadd.f32 %v1260_v5, %v1022_v6 }
 0x7c8   : > { %v1026_v9 = vadd.f32 %v1023_v7, %v1577_v22 }
 0x7ca   : > { %1027 = vst.msk [vmem:[%s469_s28] sm:$0xff] %vm481_vm0, %v1026_v9 }
 0x7cb   : > { %1312 = shalt.err (!%p1309_p3)
}
 0x7cc   : > { %1203 = dma.vmem_to_hbm [thread:$0]  (%p1472_p5), %s1042_s25, 128, %s1044_s2, %s1029_s17  }
 0x7cd   : > { %v1024_v10 = vpop.f32.mrf.mxu3 }
 0x7ce PF: > { %p1209_p4 = scmp.ge.s32.totalorder %s1347_s16, 2  ;;  %s1055_s0 = sand.u32 1, %s1335_s29  }
 0x7cf   : > { %s1056_s27 = scalar_lea.sflag [#allocation3], %s1055_s0 }
 0x7d0   : > { %p1206_p7 = pnand %p1209_p4, %p1476_p6 }
 0x7d2   : > { %p1207_p8 = pneg %p1206_p7 }
 0x7d4   : > { %1330 = dma.done.wait (%p1207_p8), %s1056_s27, 128  }
 0x7d5   : > { %1332 = vsyncadd (%p1207_p8), %s1056_s27, 4294967168  ;;  %s1689_s3 = sld [smem:[#allocation5_spill]]  ;;  %p24_p9 = scmp.ge.s32.totalorder %s1459_s19, 4  }
 0x7d6   : > { %s1690_s29 = smov %s1339_s30  ;;  %s1691_s30 = smov %s1343_s15 }
 0x7d7   : > { %s1693_s16 = smov %s1459_s19  ;;  %26 = sbr.rel (!%p24_p9) target bundleno = 8 (0x8), region = 114 }
 0x7db   : > { %s1692_s15 = smov %s1689_s3 }
 0x7dc   :  { %1062 = vsyncpa [#allocation3], 1 }
 0x7dd   :  { %1064 = vsyncpa [#allocation3 + $0x1], 1 }

</bundles_post_ra>
